<compile_context>
chip_gen: v6e
topology: v6e:2x2x1
jax: 0.10.0
libtpu: 0.0.40
codegen_flags: <defaults>
</compile_context>

<pallas_src>
import functools

import jax
import jax.numpy as jnp
from jax.experimental import pallas as pl
from jax.experimental.pallas import tpu as pltpu

tasks_to_n_labels = {"polarity": 3, "subjectivity": 1, "emotion": 7}

IN_FEATURES = 768
HIDDEN = 256
HEAD_PAD = 128          # lane-dense width for the final (3/1/7-wide) head
TILE_B_MAX = 512        # fits comfortably in v7x's 64 MiB VMEM (double-buffered)


def _round_up(x, m):
    return ((x + m - 1) // m) * m


def mlp_kernel(x_ref, w0_ref, b0_ref, w1_ref, b1_ref, w2_ref, b2_ref,
               wf_ref, bf_ref, o_ref):
    # Fused forward:
    #   x -> Linear(768,256) -> Linear(256,256) -> Linear(256,256)
    #     -> Linear(256, HEAD_PAD)   (head columns zero-padded to 128 lanes)
    # NOTE: the PyTorch loop's zip() swaps the names, so each iteration applies
    # the Linear first and then the Dropout; net effect (eval) is just Linears.
    # Dropout layers are identity in eval/inference mode.
    # TODO(synk): training-mode dropout masking (p=0.4 / p=0.5) not implemented.
    x = x_ref[...].astype(jnp.bfloat16)
    h = jnp.dot(x, w0_ref[...], preferred_element_type=jnp.float32) + b0_ref[...]
    h = jnp.dot(h.astype(jnp.bfloat16), w1_ref[...],
                preferred_element_type=jnp.float32) + b1_ref[...]
    h = jnp.dot(h.astype(jnp.bfloat16), w2_ref[...],
                preferred_element_type=jnp.float32) + b2_ref[...]
    o_ref[...] = (jnp.dot(h.astype(jnp.bfloat16), wf_ref[...],
                          preferred_element_type=jnp.float32) + bf_ref[...])


def prepare_kernel_params(params):
    """bf16 weights (halve DMA, native MXU rate), f32 biases, 128-lane head."""
    n_labels = params["wf"].shape[1]
    kp = {}
    for name in ("0", "1", "2"):
        kp[f"w{name}"] = params[f"w{name}"].astype(jnp.bfloat16)
        kp[f"b{name}"] = params[f"b{name}"].astype(jnp.float32)
    pad = HEAD_PAD - n_labels
    kp["wf"] = jnp.pad(params["wf"], ((0, 0), (0, pad))).astype(jnp.bfloat16)
    kp["bf"] = jnp.pad(params["bf"], ((0, 0), (0, pad))).astype(jnp.float32)
    return kp, n_labels


@functools.partial(jax.jit, static_argnames=("n_labels", "tile_b_max"))
def mlp_classifier_forward(x, kparams, *, n_labels, tile_b_max=TILE_B_MAX):
    """x: (B, 768) float32. kparams: output of prepare_kernel_params."""
    B = x.shape[0]
    # Batch tile: multiple of 8 (sublane), capped for VMEM; pad B up to a
    # whole number of tiles and slice the padding back off at the end.
    tile_b = min(tile_b_max, _round_up(B, 8))
    b_pad = _round_up(B, tile_b)
    if b_pad != B:
        x = jnp.pad(x, ((0, b_pad - B), (0, 0)))
    grid = (b_pad // tile_b,)

    const = lambda i: (0, 0)          # weights/biases stay resident in VMEM
    in_specs = [
        pl.BlockSpec((tile_b, IN_FEATURES), lambda i: (i, 0)),   # x tile
        pl.BlockSpec((IN_FEATURES, HIDDEN), const),              # w0
        pl.BlockSpec((1, HIDDEN), const),                        # b0
        pl.BlockSpec((HIDDEN, HIDDEN), const),                   # w1
        pl.BlockSpec((1, HIDDEN), const),                        # b1
        pl.BlockSpec((HIDDEN, HIDDEN), const),                   # w2
        pl.BlockSpec((1, HIDDEN), const),                        # b2
        pl.BlockSpec((HIDDEN, HEAD_PAD), const),                 # wf (padded)
        pl.BlockSpec((1, HEAD_PAD), const),                      # bf (padded)
    ]
    out_spec = pl.BlockSpec((tile_b, HEAD_PAD), lambda i: (i, 0))

    flops = 2 * b_pad * (IN_FEATURES * HIDDEN + 2 * HIDDEN * HIDDEN
                         + HIDDEN * HEAD_PAD)
    bytes_accessed = (
        x.size * x.dtype.itemsize
        + sum(kparams[k].size * kparams[k].dtype.itemsize
              for k in ("w0", "b0", "w1", "b1", "w2", "b2", "wf", "bf"))
        + b_pad * HEAD_PAD * 4)

    out = pl.pallas_call(
        mlp_kernel,
        out_shape=jax.ShapeDtypeStruct((b_pad, HEAD_PAD), jnp.float32),
        grid=grid,
        in_specs=in_specs,
        out_specs=out_spec,
        compiler_params=pltpu.CompilerParams(
            dimension_semantics=("parallel",)),
        cost_estimate=pl.CostEstimate(
            flops=flops, transcendentals=0, bytes_accessed=bytes_accessed),
    )(x,
      kparams["w0"], kparams["b0"],
      kparams["w1"], kparams["b1"],
      kparams["w2"], kparams["b2"],
      kparams["wf"], kparams["bf"])
    return out[:B, :n_labels]


def init_params(key, task="polarity", num_hidden_layers=2):
    """Deterministic init mimicking nn.Linear shapes (stored transposed, f32)."""
    assert num_hidden_layers == 2
    n_labels = tasks_to_n_labels[task]
    dims = [(IN_FEATURES, HIDDEN), (HIDDEN, HIDDEN), (HIDDEN, HIDDEN),
            (HIDDEN, n_labels)]
    names = ["0", "1", "2", "f"]
    params = {}
    for (din, dout), name in zip(dims, names):
        key, kw, kb = jax.random.split(key, 3)
        bound = 1.0 / jnp.sqrt(din)
        # (in, out) layout == PyTorch weight (out, in) transposed.
        params[f"w{name}"] = jax.random.uniform(
            kw, (din, dout), jnp.float32, -bound, bound)
        params[f"b{name}"] = jax.random.uniform(
            kb, (1, dout), jnp.float32, -bound, bound)
    return params


def reference_forward(x, params):
    """Pure-JAX reference using the same bf16-weight / f32-accumulate numerics."""
    def lin(a, w, b):
        return jnp.dot(a.astype(jnp.bfloat16), w.astype(jnp.bfloat16),
                       preferred_element_type=jnp.float32) + b
    h = lin(x, params["w0"], params["b0"])
    h = lin(h, params["w1"], params["b1"])
    h = lin(h, params["w2"], params["b2"])
    return lin(h, params["wf"], params["bf"])


if __name__ == "__main__":
    key = jax.random.PRNGKey(0)
    key, kx, kx2 = jax.random.split(key, 3)
    params = init_params(key, task="polarity", num_hidden_layers=2)
    kparams, n_labels = prepare_kernel_params(params)

    # Small deterministic batch (single-tile path).
    B = 8
    x = jax.random.normal(kx, (B, IN_FEATURES), jnp.float32)
    out = jax.block_until_ready(
        mlp_classifier_forward(x, kparams, n_labels=n_labels))
    ref = reference_forward(x, params)
    assert out.shape == (B, tasks_to_n_labels["polarity"])
    assert jnp.allclose(out, ref, atol=2e-2, rtol=2e-2), \
        float(jnp.max(jnp.abs(out - ref)))

    # Multi-tile path: B not divisible by the tile -> padding + 3-step grid.
    B2 = 300
    x2 = jax.random.normal(kx2, (B2, IN_FEATURES), jnp.float32)
    out2 = jax.block_until_ready(
        mlp_classifier_forward(x2, kparams, n_labels=n_labels, tile_b_max=128))
    ref2 = reference_forward(x2, params)
    assert out2.shape == (B2, n_labels)
    assert jnp.allclose(out2, ref2, atol=2e-2, rtol=2e-2), \
        float(jnp.max(jnp.abs(out2 - ref2)))

    print("KERNEL_OK")
</pallas_src>

<mosaic_0001>
module attributes {stable_mosaic.version = 11 : i64} {
  func.func @mlp_kernel(%arg0: i32, %arg1: memref<8x768xf32, #tpu.memory_space<vmem>>, %arg2: memref<768x256xbf16, #tpu.memory_space<vmem>>, %arg3: memref<1x256xf32, #tpu.memory_space<vmem>>, %arg4: memref<256x256xbf16, #tpu.memory_space<vmem>>, %arg5: memref<1x256xf32, #tpu.memory_space<vmem>>, %arg6: memref<256x256xbf16, #tpu.memory_space<vmem>>, %arg7: memref<1x256xf32, #tpu.memory_space<vmem>>, %arg8: memref<256x128xbf16, #tpu.memory_space<vmem>>, %arg9: memref<1x128xf32, #tpu.memory_space<vmem>>, %arg10: memref<8x128xf32, #tpu.memory_space<vmem>>) attributes {dimension_semantics = [#tpu.dimension_semantics<parallel>], iteration_bounds = array<i64: 1>, scalar_prefetch = 0 : i64, scratch_operands = 0 : i64, tpu.core_type = #tpu.core_type<tc>, window_params = [{transform_indices = @transform_0, window_bounds = array<i64: 8, 768>}, {pipeline_mode = #tpu.pipeline_mode<synchronous>, transform_indices = @transform_1, window_bounds = array<i64: 768, 256>}, {pipeline_mode = #tpu.pipeline_mode<synchronous>, transform_indices = @transform_2, window_bounds = array<i64: 1, 256>}, {pipeline_mode = #tpu.pipeline_mode<synchronous>, transform_indices = @transform_3, window_bounds = array<i64: 256, 256>}, {pipeline_mode = #tpu.pipeline_mode<synchronous>, transform_indices = @transform_4, window_bounds = array<i64: 1, 256>}, {pipeline_mode = #tpu.pipeline_mode<synchronous>, transform_indices = @transform_5, window_bounds = array<i64: 256, 256>}, {pipeline_mode = #tpu.pipeline_mode<synchronous>, transform_indices = @transform_6, window_bounds = array<i64: 1, 256>}, {pipeline_mode = #tpu.pipeline_mode<synchronous>, transform_indices = @transform_7, window_bounds = array<i64: 256, 128>}, {pipeline_mode = #tpu.pipeline_mode<synchronous>, transform_indices = @transform_8, window_bounds = array<i64: 1, 128>}, {transform_indices = @transform_9, window_bounds = array<i64: 8, 128>}]} {
    %c0 = arith.constant 0 : index
    %c0_0 = arith.constant 0 : index
    %0 = vector.load %arg1[%c0, %c0_0] : memref<8x768xf32, #tpu.memory_space<vmem>>, vector<8x768xf32>
    %1 = arith.truncf %0 : vector<8x768xf32> to vector<8x768xbf16>
    %c0_1 = arith.constant 0 : index
    %c0_2 = arith.constant 0 : index
    %2 = vector.load %arg2[%c0_1, %c0_2] : memref<768x256xbf16, #tpu.memory_space<vmem>>, vector<768x256xbf16>
    %cst = arith.constant dense<0.000000e+00> : vector<8x256xf32>
    %3 = tpu.matmul %1, %2, %cst {dimension_numbers = #tpu.dot_dimension_numbers<[1], [0], [0], [1], [0, 0, 1, 1], [], []>} : vector<8x768xbf16>, vector<768x256xbf16>, vector<8x256xf32> -> vector<8x256xf32>
    %c0_3 = arith.constant 0 : index
    %c0_4 = arith.constant 0 : index
    %4 = vector.load %arg3[%c0_3, %c0_4] : memref<1x256xf32, #tpu.memory_space<vmem>>, vector<1x256xf32>
    %5 = vector.broadcast %4 : vector<1x256xf32> to vector<8x256xf32>
    %6 = arith.addf %3, %5 : vector<8x256xf32>
    %7 = arith.truncf %6 : vector<8x256xf32> to vector<8x256xbf16>
    %c0_5 = arith.constant 0 : index
    %c0_6 = arith.constant 0 : index
    %8 = vector.load %arg4[%c0_5, %c0_6] : memref<256x256xbf16, #tpu.memory_space<vmem>>, vector<256x256xbf16>
    %cst_7 = arith.constant dense<0.000000e+00> : vector<8x256xf32>
    %9 = tpu.matmul %7, %8, %cst_7 {dimension_numbers = #tpu.dot_dimension_numbers<[1], [0], [0], [1], [0, 0, 1, 1], [], []>} : vector<8x256xbf16>, vector<256x256xbf16>, vector<8x256xf32> -> vector<8x256xf32>
    %c0_8 = arith.constant 0 : index
    %c0_9 = arith.constant 0 : index
    %10 = vector.load %arg5[%c0_8, %c0_9] : memref<1x256xf32, #tpu.memory_space<vmem>>, vector<1x256xf32>
    %11 = vector.broadcast %10 : vector<1x256xf32> to vector<8x256xf32>
    %12 = arith.addf %9, %11 : vector<8x256xf32>
    %13 = arith.truncf %12 : vector<8x256xf32> to vector<8x256xbf16>
    %c0_10 = arith.constant 0 : index
    %c0_11 = arith.constant 0 : index
    %14 = vector.load %arg6[%c0_10, %c0_11] : memref<256x256xbf16, #tpu.memory_space<vmem>>, vector<256x256xbf16>
    %cst_12 = arith.constant dense<0.000000e+00> : vector<8x256xf32>
    %15 = tpu.matmul %13, %14, %cst_12 {dimension_numbers = #tpu.dot_dimension_numbers<[1], [0], [0], [1], [0, 0, 1, 1], [], []>} : vector<8x256xbf16>, vector<256x256xbf16>, vector<8x256xf32> -> vector<8x256xf32>
    %c0_13 = arith.constant 0 : index
    %c0_14 = arith.constant 0 : index
    %16 = vector.load %arg7[%c0_13, %c0_14] : memref<1x256xf32, #tpu.memory_space<vmem>>, vector<1x256xf32>
    %17 = vector.broadcast %16 : vector<1x256xf32> to vector<8x256xf32>
    %18 = arith.addf %15, %17 : vector<8x256xf32>
    %19 = arith.truncf %18 : vector<8x256xf32> to vector<8x256xbf16>
    %c0_15 = arith.constant 0 : index
    %c0_16 = arith.constant 0 : index
    %20 = vector.load %arg8[%c0_15, %c0_16] : memref<256x128xbf16, #tpu.memory_space<vmem>>, vector<256x128xbf16>
    %cst_17 = arith.constant dense<0.000000e+00> : vector<8x128xf32>
    %21 = tpu.matmul %19, %20, %cst_17 {dimension_numbers = #tpu.dot_dimension_numbers<[1], [0], [0], [1], [0, 0, 1, 1], [], []>} : vector<8x256xbf16>, vector<256x128xbf16>, vector<8x128xf32> -> vector<8x128xf32>
    %c0_18 = arith.constant 0 : index
    %c0_19 = arith.constant 0 : index
    %22 = vector.load %arg9[%c0_18, %c0_19] : memref<1x128xf32, #tpu.memory_space<vmem>>, vector<1x128xf32>
    %23 = vector.broadcast %22 : vector<1x128xf32> to vector<8x128xf32>
    %24 = arith.addf %21, %23 : vector<8x128xf32>
    %c0_20 = arith.constant 0 : index
    %c0_21 = arith.constant 0 : index
    %25 = vector.load %arg10[%c0_20, %c0_21] : memref<8x128xf32, #tpu.memory_space<vmem>>, vector<8x128xf32>
    tpu.vector_store %arg10[%c0_20, %c0_21], %24 {strides = array<i32>} : memref<8x128xf32, #tpu.memory_space<vmem>>, vector<8x128xf32>,
    return
  }
  func.func @transform_0(%arg0: i32) -> (i32, i32) {
    %c0_i32 = arith.constant 0 : i32
    %c0_i32_0 = arith.constant 0 : i32
    return %arg0, %c0_i32 : i32, i32
  }
  func.func @transform_1(%arg0: i32) -> (i32, i32) {
    %c0_i32 = arith.constant 0 : i32
    %c0_i32_0 = arith.constant 0 : i32
    %c0_i32_1 = arith.constant 0 : i32
    return %c0_i32, %c0_i32_0 : i32, i32
  }
  func.func @transform_2(%arg0: i32) -> (i32, i32) {
    %c0_i32 = arith.constant 0 : i32
    %c0_i32_0 = arith.constant 0 : i32
    %c0_i32_1 = arith.constant 0 : i32
    return %c0_i32, %c0_i32_0 : i32, i32
  }
  func.func @transform_3(%arg0: i32) -> (i32, i32) {
    %c0_i32 = arith.constant 0 : i32
    %c0_i32_0 = arith.constant 0 : i32
    %c0_i32_1 = arith.constant 0 : i32
    return %c0_i32, %c0_i32_0 : i32, i32
  }
  func.func @transform_4(%arg0: i32) -> (i32, i32) {
    %c0_i32 = arith.constant 0 : i32
    %c0_i32_0 = arith.constant 0 : i32
    %c0_i32_1 = arith.constant 0 : i32
    return %c0_i32, %c0_i32_0 : i32, i32
  }
  func.func @transform_5(%arg0: i32) -> (i32, i32) {
    %c0_i32 = arith.constant 0 : i32
    %c0_i32_0 = arith.constant 0 : i32
    %c0_i32_1 = arith.constant 0 : i32
    return %c0_i32, %c0_i32_0 : i32, i32
  }
  func.func @transform_6(%arg0: i32) -> (i32, i32) {
    %c0_i32 = arith.constant 0 : i32
    %c0_i32_0 = arith.constant 0 : i32
    %c0_i32_1 = arith.constant 0 : i32
    return %c0_i32, %c0_i32_0 : i32, i32
  }
  func.func @transform_7(%arg0: i32) -> (i32, i32) {
    %c0_i32 = arith.constant 0 : i32
    %c0_i32_0 = arith.constant 0 : i32
    %c0_i32_1 = arith.constant 0 : i32
    return %c0_i32, %c0_i32_0 : i32, i32
  }
  func.func @transform_8(%arg0: i32) -> (i32, i32) {
    %c0_i32 = arith.constant 0 : i32
    %c0_i32_0 = arith.constant 0 : i32
    %c0_i32_1 = arith.constant 0 : i32
    return %c0_i32, %c0_i32_0 : i32, i32
  }
  func.func @transform_9(%arg0: i32) -> (i32, i32) {
    %c0_i32 = arith.constant 0 : i32
    %c0_i32_0 = arith.constant 0 : i32
    return %arg0, %c0_i32 : i32, i32
  }
}

</mosaic_0001>

<bundles_post_ra>
// kernel: mlp_classifier_forward.1
= control target key start
LH: loop header
LB: loop body
LE: loop exit
PB: predicated region body
PF: predicated region fallthrough
CT: control target
= control target key end

     0   :  { %14 = vsyncpa [#allocation3], 0  ;;  %s2216_s0 = inlined_call_operand.hbm [shape: f32[8,768], index: 0, kind: input, shape index: {}]   ;;  %s2217_s1 = inlined_call_operand.hbm [shape: bf16[768,256], index: 1, kind: input, shape index: {}]   ;;  %s2218_s2 = inlined_call_operand.hbm [shape: f32[1,256], index: 2, kind: input, shape index: {}]   ;;  %s2219_s3 = inlined_call_operand.hbm [shape: bf16[256,256], index: 3, kind: input, shape index: {}]   ;;  %s2220_s4 = inlined_call_operand.vmem [shape: f32[1,256], index: 4, kind: input, shape index: {}]   ;;  %s2221_s5 = inlined_call_operand.hbm [shape: bf16[256,256], index: 5, kind: input, shape index: {}]   ;;  %s2222_s6 = inlined_call_operand.vmem [shape: f32[1,256], index: 6, kind: input, shape index: {}]   ;;  %s2223_s7 = inlined_call_operand.hbm [shape: bf16[256,128], index: 7, kind: input, shape index: {}]   ;;  %s2224_s8 = inlined_call_operand.vmem [shape: f32[1,128], index: 8, kind: input, shape index: {}]   ;;  %s2225_s9 = inlined_call_operand.vmem [shape: f32[8,128], index: 9, kind: output, shape index: {}]  }
   0x1   :  { %15 = vsyncpa [#allocation5], 0 }
   0x2   :  { %16 = vsyncpa [#allocation8], 0 }
   0x3   :  { %17 = vsyncpa [#allocation11], 0  ;;  %s2107_s30 = smov [#allocation4]  }
   0x4   :  { %s33_s10 = sshll.u32 %s2107_s30, 4  ;;  %s34_s10 = int_to_ptr.vmem [resolvable:$true] %s33_s10 }
   0x5   :  { %s1987_s11 = scalar_lea.vmem %s34_s10, 12288  ;;  %p1992_p1 = scmp.lt.s32.totalorder %s34_s10, %s34_s10 }
   0x6   :  { %p1988_p0 = scmp.ne.s32.totalorder %s34_s10, %s1987_s11  ;;  %p1993_p2 = scmp.lt.s32.totalorder %s1987_s11, %s1987_s11 }
   0x8   :  { %p1994_p3 = por %p1993_p2, %p1992_p1 }
   0xa   :  { %p1995_p4 = pnand %p1994_p3, %p1988_p0 }
   0xc   :  { %1998 = shalt.err (!%p1995_p4)
}
   0xd   :  { %s2108_s12 = smov 128   ;;  %s2109_s13 = smov 8  }
   0xe   :  { %39 = dma.hbm_to_vmem [thread:$0]  %s2217_s1, 12288, %s34_s10, [#allocation5], %s2108_s12, %s2108_s12, %s2109_s13  }
   0xf   :  { %s2110_s16 = smov [#allocation7]   ;;  %s2111_s18 = smov [#allocation2]  }
  0x10   :  { %s55_s17 = sshll.u32 %s2110_s16, 4  ;;  %s24_s19 = sshll.u32 %s2111_s18, 4  ;;  %s56_s17 = int_to_ptr.vmem [resolvable:$true] %s55_s17  ;;  %s25_s19 = int_to_ptr.vmem [resolvable:$true] %s24_s19 }
  0x11   :  { %s2007_s20 = scalar_lea.vmem %s56_s17, 4096  ;;  %p2012_p6 = scmp.lt.s32.totalorder %s56_s17, %s56_s17 }
  0x12   :  { %p2008_p5 = scmp.ne.s32.totalorder %s56_s17, %s2007_s20  ;;  %p2013_p7 = scmp.lt.s32.totalorder %s2007_s20, %s2007_s20 }
  0x14   :  { %p2014_p8 = por %p2013_p7, %p2012_p6 }
  0x16   :  { %p2015_p9 = pnand %p2014_p8, %p2008_p5 }
  0x18   :  { %2018 = shalt.err (!%p2015_p9)
}
  0x19   :  { %61 = dma.hbm_to_vmem [thread:$0]  %s2219_s3, 4096, %s56_s17, [#allocation8], %s2108_s12, %s2108_s12, %s2109_s13  }
  0x1a   :  { %s2027_s1 = scalar_lea.vmem %s25_s19, 768  ;;  %p2032_p11 = scmp.lt.s32.totalorder %s25_s19, %s25_s19 }
  0x1b   :  { %p2028_p10 = scmp.ne.s32.totalorder %s25_s19, %s2027_s1  ;;  %p2033_p12 = scmp.lt.s32.totalorder %s2027_s1, %s2027_s1 }
  0x1d   :  { %p2034_p13 = por %p2033_p12, %p2032_p11 }
  0x1f   :  { %p2035_p0 = pnand %p2034_p13, %p2028_p10 }
  0x21   :  { %2038 = shalt.err (!%p2035_p0)
}
  0x22   :  { %27 = dma.hbm_to_vmem [thread:$0]  %s2216_s0, 768, %s25_s19, [#allocation3]  }
  0x23   :  { %s2112_s25 = smov [#allocation6]   ;;  %s2113_s27 = smov [#allocation9]  }
  0x24   :  { %s46_s26 = sshll.u32 %s2112_s25, 4  ;;  %s69_s28 = sshll.u32 %s2113_s27, 4  ;;  %s47_s26 = int_to_ptr.vmem [resolvable:$true] %s46_s26  ;;  %s70_s28 = int_to_ptr.vmem [resolvable:$true] %s69_s28 }
  0x25   :  { %s2047_s29 = scalar_lea.vmem %s47_s26, 32  ;;  %p2052_p2 = scmp.lt.s32.totalorder %s47_s26, %s47_s26 }
  0x26   :  { %p2048_p1 = scmp.ne.s32.totalorder %s47_s26, %s2047_s29  ;;  %p2053_p3 = scmp.lt.s32.totalorder %s2047_s29, %s2047_s29 }
  0x28   :  { %p2054_p4 = por %p2053_p3, %p2052_p2 }
  0x2a   :  { %p2055_p5 = pnand %p2054_p4, %p2048_p1 }
  0x2c   :  { %2058 = shalt.err (!%p2055_p5)
}
  0x2d   :  { %49 = dma.hbm_to_vmem [thread:$0]  %s2218_s2, 32, %s47_s26, [#allocation5]  }
  0x2e   :  { %s2067_s10 = scalar_lea.vmem %s70_s28, 4096  ;;  %p2072_p7 = scmp.lt.s32.totalorder %s70_s28, %s70_s28 }
  0x2f   :  { %p2068_p6 = scmp.ne.s32.totalorder %s70_s28, %s2067_s10  ;;  %p2073_p8 = scmp.lt.s32.totalorder %s2067_s10, %s2067_s10 }
  0x31   :  { %p2074_p9 = por %p2073_p8, %p2072_p7 }
  0x33   :  { %p2075_p10 = pnand %p2074_p9, %p2068_p6 }
  0x35   :  { %2078 = shalt.err (!%p2075_p10)
}
  0x36   :  { %75 = dma.hbm_to_vmem [thread:$0]  %s2221_s5, 4096, %s70_s28, [#allocation8], %s2108_s12, %s2108_s12, %s2109_s13  }
  0x37   :  { %s2114_s14 = smov [#allocation10]  }
  0x38   :  { %s83_s15 = sshll.u32 %s2114_s14, 4  ;;  %s84_s15 = int_to_ptr.vmem [resolvable:$true] %s83_s15 }
  0x39   :  { %s2087_s16 = scalar_lea.vmem %s84_s15, 2048  ;;  %p2092_p12 = scmp.lt.s32.totalorder %s84_s15, %s84_s15 }
  0x3a   :  { %p2088_p11 = scmp.ne.s32.totalorder %s84_s15, %s2087_s16  ;;  %p2093_p13 = scmp.lt.s32.totalorder %s2087_s16, %s2087_s16 }
  0x3c   :  { %p2094_p0 = por %p2093_p13, %p2092_p12 }
  0x3e   :  { %p2095_p1 = pnand %p2094_p0, %p2088_p11 }
  0x40   :  { %2098 = shalt.err (!%p2095_p1)
}
  0x41   :  { %s2115_s2 = smov 64   ;;  %s2116_s17 = smov 4  }
  0x42   :  { %89 = dma.hbm_to_vmem [thread:$0]  %s2223_s7, 2048, %s84_s15, [#allocation11], %s2115_s2, %s2115_s2, %s2116_s17  }
  0x43   :  { %2099 = dma.done.wait [#allocation3], 768  }
  0x44   :  { %2100 = vsyncadd [#allocation3], 4294966528 }
  0x45   :  { %2101 = dma.done.wait [#allocation5], 12320  }
  0x46   :  { %2102 = vsyncadd [#allocation5], 4294954976 }
  0x47   :  { %2103 = dma.done.wait [#allocation8], 8192  }
  0x48   :  { %2104 = vsyncadd [#allocation8], 4294959104 }
  0x49   :  { %2105 = dma.done.wait [#allocation11], 2048  }
  0x4a   :  { %2106 = vsyncadd [#allocation11], 4294965248  ;;  %v1723_v0 = vld [vmem:[#allocation4 + $0x74] ss:$8 sps:$4 sm:$0xff]   ;;  %v1725_v1 = vld [vmem:[#allocation4 + $0x70] ss:$8 sps:$4 sm:$0xff]  }
  0x4b   :  { %711 = vmatprep.subr.bf16.mxu0 %v1723_v0  ;;  %v1726_v2 = vld [vmem:[#allocation4 + $0x174] ss:$8 sps:$4 sm:$0xff]   ;;  %v1728_v3 = vld [vmem:[#allocation4 + $0x170] ss:$8 sps:$4 sm:$0xff]   ;;  %v1729_v4 = vld [vmem:[#allocation4 + $0x64] ss:$8 sps:$4 sm:$0xff]  }
  0x4c   :  { %712 = vmatpush1.bf16.msra.mxu0 %v1725_v1  ;;  %v1731_v5 = vld [vmem:[#allocation4 + $0x60] ss:$8 sps:$4 sm:$0xff]   ;;  %752 = vmatprep.subr.bf16.mxu1 %v1726_v2  ;;  %v1732_v6 = vld [vmem:[#allocation4 + $0x164] ss:$8 sps:$4 sm:$0xff]   ;;  %v1735_v8 = vld [vmem:[#allocation4 + $0x54] ss:$8 sps:$4 sm:$0xff]  }
  0x4d   :  { %753 = vmatpush1.bf16.msra.mxu1 %v1728_v3  ;;  %713 = vmatprep.subr.bf16.mxu0 %v1729_v4  ;;  %v1734_v7 = vld [vmem:[#allocation4 + $0x160] ss:$8 sps:$4 sm:$0xff]   ;;  %v1737_v9 = vld [vmem:[#allocation4 + $0x50] ss:$8 sps:$4 sm:$0xff]   ;;  %v1738_v10 = vld [vmem:[#allocation4 + $0x154] ss:$8 sps:$4 sm:$0xff]  }
  0x4e   :  { %754 = vmatprep.subr.bf16.mxu1 %v1732_v6  ;;  %v1741_v11 = vld [vmem:[#allocation4 + $0x44] ss:$8 sps:$4 sm:$0xff]   ;;  %v1740_v12 = vld [vmem:[#allocation4 + $0x150] ss:$8 sps:$4 sm:$0xff]   ;;  %v1743_v14 = vld [vmem:[#allocation4 + $0x40] ss:$8 sps:$4 sm:$0xff]  }
  0x4f   :  { %v1744_v13 = vld [vmem:[#allocation4 + $0x144] ss:$8 sps:$4 sm:$0xff]   ;;  %v1747_v15 = vld [vmem:[#allocation4 + $0x34] ss:$8 sps:$4 sm:$0xff]   ;;  %v1746_v16 = vld [vmem:[#allocation4 + $0x140] ss:$8 sps:$4 sm:$0xff]  }
  0x50   :  { %714 = vmatpush1.bf16.msra.mxu0 %v1731_v5  ;;  %v1750_v17 = vld [vmem:[#allocation4 + $0x134] ss:$8 sps:$4 sm:$0xff]   ;;  %v1749_v18 = vld [vmem:[#allocation4 + $0x30] ss:$8 sps:$4 sm:$0xff]   ;;  %v1753_v19 = vld [vmem:[#allocation4 + $0x24] ss:$8 sps:$4 sm:$0xff]  }
  0x51   :  { %715 = vmatprep.subr.bf16.mxu0 %v1735_v8  ;;  %755 = vmatpush1.bf16.msra.mxu1 %v1734_v7  ;;  %v1752_v20 = vld [vmem:[#allocation4 + $0x130] ss:$8 sps:$4 sm:$0xff]   ;;  %v1756_v21 = vld [vmem:[#allocation4 + $0x124] ss:$8 sps:$4 sm:$0xff]   ;;  %v1755_v22 = vld [vmem:[#allocation4 + $0x20] ss:$8 sps:$4 sm:$0xff]  }
  0x52   :  { %756 = vmatprep.subr.bf16.mxu1 %v1738_v10  ;;  %v1759_v23 = vld [vmem:[#allocation4 + $0x14] ss:$8 sps:$4 sm:$0xff]   ;;  %v1758_v24 = vld [vmem:[#allocation4 + $0x120] ss:$8 sps:$4 sm:$0xff]   ;;  %v1761_v26 = vld [vmem:[#allocation4 + $0x10] ss:$8 sps:$4 sm:$0xff]  }
  0x53   :  { %v1762_v25 = vld [vmem:[#allocation4 + $0x114] ss:$8 sps:$4 sm:$0xff]   ;;  %v1765_v27 = vld [vmem:[#allocation4 + $0x4] ss:$8 sps:$4 sm:$0xff]   ;;  %v1764_v28 = vld [vmem:[#allocation4 + $0x110] ss:$8 sps:$4 sm:$0xff]  }
  0x54   :  { %716 = vmatpush1.bf16.msra.mxu0 %v1737_v9  ;;  %v1768_v29 = vld [vmem:[#allocation4 + $0x104] ss:$8 sps:$4 sm:$0xff]   ;;  %v1767_v30 = vld [vmem:[#allocation4] ss:$8 sps:$4 sm:$0xff]   ;;  %v1771_v31 = vld [vmem:[#allocation4 + $0xf4] ss:$8 sps:$4 sm:$0xff]  }
  0x55   :  { %717 = vmatprep.subr.bf16.mxu0 %v1741_v11  ;;  %757 = vmatpush1.bf16.msra.mxu1 %v1740_v12  ;;  %v1770_v32 = vld [vmem:[#allocation4 + $0x100] ss:$8 sps:$4 sm:$0xff]   ;;  %v1774_v33 = vld [vmem:[#allocation4 + $0x1f4] ss:$8 sps:$4 sm:$0xff]   ;;  %v1773_v34 = vld [vmem:[#allocation4 + $0xf0] ss:$8 sps:$4 sm:$0xff]  }
  0x56   :  { %758 = vmatprep.subr.bf16.mxu1 %v1744_v13  ;;  %v1777_v35 = vld [vmem:[#allocation4 + $0xe4] ss:$8 sps:$4 sm:$0xff]   ;;  %v1776_v36 = vld [vmem:[#allocation4 + $0x1f0] ss:$8 sps:$4 sm:$0xff]   ;;  %v1779_v38 = vld [vmem:[#allocation4 + $0xe0] ss:$8 sps:$4 sm:$0xff]  }
  0x57   :  { %v1780_v37 = vld [vmem:[#allocation4 + $0x1e4] ss:$8 sps:$4 sm:$0xff]   ;;  %v1783_v39 = vld [vmem:[#allocation4 + $0xd4] ss:$8 sps:$4 sm:$0xff]   ;;  %v1782_v40 = vld [vmem:[#allocation4 + $0x1e0] ss:$8 sps:$4 sm:$0xff]  }
  0x58   :  { %718 = vmatpush1.bf16.msra.mxu0 %v1743_v14  ;;  %v1786_v41 = vld [vmem:[#allocation4 + $0x1d4] ss:$8 sps:$4 sm:$0xff]   ;;  %v1785_v42 = vld [vmem:[#allocation4 + $0xd0] ss:$8 sps:$4 sm:$0xff]   ;;  %v1789_v43 = vld [vmem:[#allocation4 + $0xc4] ss:$8 sps:$4 sm:$0xff]  }
  0x59   :  { %719 = vmatprep.subr.bf16.mxu0 %v1747_v15  ;;  %759 = vmatpush1.bf16.msra.mxu1 %v1746_v16  ;;  %v1788_v44 = vld [vmem:[#allocation4 + $0x1d0] ss:$8 sps:$4 sm:$0xff]   ;;  %v1792_v45 = vld [vmem:[#allocation4 + $0x1c4] ss:$8 sps:$4 sm:$0xff]   ;;  %v1791_v47 = vld [vmem:[#allocation4 + $0xc0] ss:$8 sps:$4 sm:$0xff]  }
  0x5a   :  { %760 = vmatprep.subr.bf16.mxu1 %v1750_v17  ;;  %v112_v46 = vld [vmem:[#allocation2 + $0x8] sm:$0xff]  ;;  %v114_v50 = vld [vmem:[#allocation2 + $0x18] sm:$0xff]  ;;  %v111_v4 = vld [vmem:[#allocation2] sm:$0xff] }
  0x5b   :  { %v118_v48 = vpack.c.bf16 %v112_v46, %v112_v46  ;;  %v1795_v49 = vld [vmem:[#allocation4 + $0xb4] ss:$8 sps:$4 sm:$0xff]   ;;  %v1794_v51 = vld [vmem:[#allocation4 + $0x1c0] ss:$8 sps:$4 sm:$0xff]   ;;  %v120_v52 = vpack.c.bf16 %v114_v50, %v114_v50  ;;  %v1797_v54 = vld [vmem:[#allocation4 + $0xb0] ss:$8 sps:$4 sm:$0xff]   ;;  %v117_v7 = vpack.c.bf16 %v111_v4, %v111_v4 }
  0x5c   :  { %720 = vmatpush1.bf16.msra.mxu0 %v1749_v18  ;;  %v1798_v53 = vld [vmem:[#allocation4 + $0x1b4] ss:$8 sps:$4 sm:$0xff]   ;;  %v1801_v55 = vld [vmem:[#allocation4 + $0xa4] ss:$8 sps:$4 sm:$0xff]   ;;  %v1800_v56 = vld [vmem:[#allocation4 + $0x1b0] ss:$8 sps:$4 sm:$0xff]  }
  0x5d   :  { %721 = vmatprep.subr.bf16.mxu0 %v1753_v19  ;;  %761 = vmatpush1.bf16.msra.mxu1 %v1752_v20  ;;  %v1804_v57 = vld [vmem:[#allocation4 + $0x1a4] ss:$8 sps:$4 sm:$0xff]   ;;  %v1803_v58 = vld [vmem:[#allocation4 + $0xa0] ss:$8 sps:$4 sm:$0xff]   ;;  %v1807_v59 = vld [vmem:[#allocation4 + $0x94] ss:$8 sps:$4 sm:$0xff]  }
  0x5e   :  { %762 = vmatprep.subr.bf16.mxu1 %v1756_v21  ;;  %743 = vmatprep.mubr.bf16.mxu0 %v118_v48  ;;  %v1806_v60 = vld [vmem:[#allocation4 + $0x1a0] ss:$8 sps:$4 sm:$0xff]   ;;  %v1810_v61 = vld [vmem:[#allocation4 + $0x194] ss:$8 sps:$4 sm:$0xff]   ;;  %v1809_v62 = vld [vmem:[#allocation4 + $0x90] ss:$8 sps:$4 sm:$0xff]  }
  0x5f   :  { %784 = vmatprep.mubr.bf16.mxu1 %v120_v52  ;;  %v1813_v63 = vld [vmem:[#allocation4 + $0x84] ss:$8 sps:$4 sm:$0xff]   ;;  %v1812_v0 = vld [vmem:[#allocation4 + $0x190] ss:$8 sps:$4 sm:$0xff]   ;;  %v1815_v1 = vld [vmem:[#allocation4 + $0x80] ss:$8 sps:$4 sm:$0xff]  }
  0x60   :  { %722 = vmatpush1.bf16.msra.mxu0 %v1755_v22  ;;  %v1816_v2 = vld [vmem:[#allocation4 + $0x184] ss:$8 sps:$4 sm:$0xff]   ;;  %v1818_v3 = vld [vmem:[#allocation4 + $0x180] ss:$8 sps:$4 sm:$0xff]   ;;  %v1821_v5 = vld [vmem:[#allocation4 + $0x274] ss:$8 sps:$4 sm:$0xff]  }
  0x61   :  { %723 = vmatprep.subr.bf16.mxu0 %v1759_v23  ;;  %763 = vmatpush1.bf16.msra.mxu1 %v1758_v24  ;;  %v113_v6 = vld [vmem:[#allocation2 + $0x10] sm:$0xff]  ;;  %v1819_v8 = vld [vmem:[#allocation4 + $0x270] ss:$8 sps:$4 sm:$0xff]   ;;  %v1827_v13 = vld [vmem:[#allocation4 + $0x254] ss:$8 sps:$4 sm:$0xff]  }
  0x62   :  { %764 = vmatprep.subr.bf16.mxu1 %v1762_v25  ;;  %v119_v9 = vpack.c.bf16 %v113_v6, %v113_v6  ;;  %v1824_v10 = vld [vmem:[#allocation4 + $0x264] ss:$8 sps:$4 sm:$0xff]   ;;  %v1822_v11 = vld [vmem:[#allocation4 + $0x260] ss:$8 sps:$4 sm:$0xff]   ;;  %v116_v12 = vld [vmem:[#allocation2 + $0x28] sm:$0xff] }
  0x63   :  { %v122_v14 = vpack.c.bf16 %v116_v12, %v116_v12  ;;  %v1825_v15 = vld [vmem:[#allocation4 + $0x250] ss:$8 sps:$4 sm:$0xff]   ;;  %v1830_v16 = vld [vmem:[#allocation4 + $0x244] ss:$8 sps:$4 sm:$0xff]   ;;  %v1828_v17 = vld [vmem:[#allocation4 + $0x240] ss:$8 sps:$4 sm:$0xff]  }
  0x64   :  { %724 = vmatpush1.bf16.msra.mxu0 %v1761_v26  ;;  %v1833_v18 = vld [vmem:[#allocation4 + $0x234] ss:$8 sps:$4 sm:$0xff]   ;;  %v1831_v19 = vld [vmem:[#allocation4 + $0x230] ss:$8 sps:$4 sm:$0xff]   ;;  %v1836_v20 = vld [vmem:[#allocation4 + $0x224] ss:$8 sps:$4 sm:$0xff]  }
  0x65   :  { %725 = vmatprep.subr.bf16.mxu0 %v1765_v27  ;;  %765 = vmatpush1.bf16.msra.mxu1 %v1764_v28  ;;  %v1834_v21 = vld [vmem:[#allocation4 + $0x220] ss:$8 sps:$4 sm:$0xff]   ;;  %v1839_v22 = vld [vmem:[#allocation4 + $0x214] ss:$8 sps:$4 sm:$0xff]   ;;  %v1837_v23 = vld [vmem:[#allocation4 + $0x210] ss:$8 sps:$4 sm:$0xff]  }
  0x66   :  { %766 = vmatprep.subr.bf16.mxu1 %v1768_v29  ;;  %v1842_v24 = vld [vmem:[#allocation4 + $0x204] ss:$8 sps:$4 sm:$0xff]   ;;  %v1840_v25 = vld [vmem:[#allocation4 + $0x200] ss:$8 sps:$4 sm:$0xff]   ;;  %v1845_v26 = vld [vmem:[#allocation4 + $0x2f4] ss:$8 sps:$4 sm:$0xff]  }
  0x67   :  { %v1843_v27 = vld [vmem:[#allocation4 + $0x2f0] ss:$8 sps:$4 sm:$0xff]   ;;  %v1848_v28 = vld [vmem:[#allocation4 + $0x2e4] ss:$8 sps:$4 sm:$0xff]   ;;  %v1846_v29 = vld [vmem:[#allocation4 + $0x2e0] ss:$8 sps:$4 sm:$0xff]  }
  0x68   :  { %726 = vmatpush1.bf16.msra.mxu0 %v1767_v30  ;;  %v1851_v30 = vld [vmem:[#allocation4 + $0x2d4] ss:$8 sps:$4 sm:$0xff]   ;;  %v1872_v46 = vld [vmem:[#allocation7 + $0x64] ss:$8 sps:$4 sm:$0xff]  }
  0x69   :  { %727 = vmatprep.subr.bf16.mxu0 %v1771_v31  ;;  %767 = vmatpush1.bf16.msra.mxu1 %v1770_v32  ;;  %v1849_v31 = vld [vmem:[#allocation4 + $0x2d0] ss:$8 sps:$4 sm:$0xff]   ;;  %v1854_v32 = vld [vmem:[#allocation4 + $0x2c4] ss:$8 sps:$4 sm:$0xff]  }
  0x6a   :  { %768 = vmatprep.subr.bf16.mxu1 %v1774_v33  ;;  %v1852_v33 = vld [vmem:[#allocation4 + $0x2c0] ss:$8 sps:$4 sm:$0xff]   ;;  %v1915_v12 = vld [vmem:[#allocation9 + $0x70] ss:$8 sps:$4 sm:$0xff]  }
  0x6b   :  { %v1875_v48 = vld [vmem:[#allocation7 + $0x54] ss:$8 sps:$4 sm:$0xff]   ;;  %v1878_v50 = vld [vmem:[#allocation7 + $0x44] ss:$8 sps:$4 sm:$0xff]  }
  0x6c   :  { %728 = vmatpush2.bf16.msra.mxu0 %v1773_v34  ;;  %v1857_v34 = vld [vmem:[#allocation4 + $0x2b4] ss:$8 sps:$4 sm:$0xff]   ;;  %v1908_v6 = vld [vmem:[#allocation7 + $0xa4] ss:$8 sps:$4 sm:$0xff]  }
  0x6d   :  { %729 = vmatprep.subr.bf16.mxu0 %v1777_v35  ;;  %769 = vmatpush2.bf16.msra.mxu1 %v1776_v36  ;;  %v1855_v35 = vld [vmem:[#allocation4 + $0x2b0] ss:$8 sps:$4 sm:$0xff]   ;;  %v1860_v36 = vld [vmem:[#allocation4 + $0x2a4] ss:$8 sps:$4 sm:$0xff]  }
  0x6e   :  { %770 = vmatprep.subr.bf16.mxu1 %v1780_v37  ;;  %v1858_v37 = vld [vmem:[#allocation4 + $0x2a0] ss:$8 sps:$4 sm:$0xff]  }
  0x6f   :  { %v1881_v52 = vld [vmem:[#allocation7 + $0x34] ss:$8 sps:$4 sm:$0xff]  }
  0x70   :  { %730 = vmatpush2.bf16.msra.mxu0 %v1779_v38  ;;  %v1863_v38 = vld [vmem:[#allocation4 + $0x294] ss:$8 sps:$4 sm:$0xff]  }
  0x71   :  { %731 = vmatprep.subr.bf16.mxu0 %v1783_v39  ;;  %771 = vmatpush2.bf16.msra.mxu1 %v1782_v40  ;;  %v1861_v39 = vld [vmem:[#allocation4 + $0x290] ss:$8 sps:$4 sm:$0xff]   ;;  %v1866_v40 = vld [vmem:[#allocation4 + $0x284] ss:$8 sps:$4 sm:$0xff]  }
  0x72   :  { %772 = vmatprep.subr.bf16.mxu1 %v1786_v41  ;;  %v1864_v41 = vld [vmem:[#allocation4 + $0x280] ss:$8 sps:$4 sm:$0xff]  }
  0x73   :  { %v1905_v4 = vld [vmem:[#allocation7 + $0xb4] ss:$8 sps:$4 sm:$0xff]  }
  0x74   :  { %732 = vmatpush2.bf16.msra.mxu0 %v1785_v42  ;;  %v115_v42 = vld [vmem:[#allocation2 + $0x20] sm:$0xff] }
  0x75   :  { %733 = vmatprep.subr.bf16.mxu0 %v1789_v43  ;;  %773 = vmatpush2.bf16.msra.mxu1 %v1788_v44  ;;  %v121_v43 = vpack.c.bf16 %v115_v42, %v115_v42  ;;  %v1867_v44 = vld [vmem:[#allocation7 + $0x70] ss:$8 sps:$4 sm:$0xff]  }
  0x76   :  { %774 = vmatprep.subr.bf16.mxu1 %v1792_v45  ;;  %v1869_v45 = vld [vmem:[#allocation7 + $0x74] ss:$8 sps:$4 sm:$0xff]  }
  0x78   :  { %734 = vmatpush2.bf16.msra.mxu0 %v1791_v47  ;;  %v1870_v47 = vld [vmem:[#allocation7 + $0x60] ss:$8 sps:$4 sm:$0xff]  }
  0x79   :  { %735 = vmatprep.subr.bf16.mxu0 %v1795_v49  ;;  %775 = vmatpush2.bf16.msra.mxu1 %v1794_v51  ;;  %v1873_v49 = vld [vmem:[#allocation7 + $0x50] ss:$8 sps:$4 sm:$0xff]   ;;  %v1876_v51 = vld [vmem:[#allocation7 + $0x40] ss:$8 sps:$4 sm:$0xff]  }
  0x7a   :  { %776 = vmatprep.subr.bf16.mxu1 %v1798_v53  ;;  %v1879_v53 = vld [vmem:[#allocation7 + $0x30] ss:$8 sps:$4 sm:$0xff]  }
  0x7c   :  { %736 = vmatpush2.bf16.msra.mxu0 %v1797_v54  ;;  %v1884_v54 = vld [vmem:[#allocation7 + $0x24] ss:$8 sps:$4 sm:$0xff]  }
  0x7d   :  { %737 = vmatprep.subr.bf16.mxu0 %v1801_v55  ;;  %777 = vmatpush2.bf16.msra.mxu1 %v1800_v56  ;;  %v1882_v55 = vld [vmem:[#allocation7 + $0x20] ss:$8 sps:$4 sm:$0xff]   ;;  %v1887_v56 = vld [vmem:[#allocation7 + $0x14] ss:$8 sps:$4 sm:$0xff]  }
  0x7e   :  { %778 = vmatprep.subr.bf16.mxu1 %v1804_v57  ;;  %v1885_v57 = vld [vmem:[#allocation7 + $0x10] ss:$8 sps:$4 sm:$0xff]  }
  0x80   :  { %738 = vmatpush2.bf16.msra.mxu0 %v1803_v58  ;;  %v1890_v58 = vld [vmem:[#allocation7 + $0x4] ss:$8 sps:$4 sm:$0xff]  }
  0x81   :  { %739 = vmatprep.subr.bf16.mxu0 %v1807_v59  ;;  %779 = vmatpush2.bf16.msra.mxu1 %v1806_v60  ;;  %v1888_v59 = vld [vmem:[#allocation7] ss:$8 sps:$4 sm:$0xff]   ;;  %v1893_v60 = vld [vmem:[#allocation7 + $0xf4] ss:$8 sps:$4 sm:$0xff]  }
  0x82   :  { %780 = vmatprep.subr.bf16.mxu1 %v1810_v61  ;;  %v1891_v61 = vld [vmem:[#allocation7 + $0xf0] ss:$8 sps:$4 sm:$0xff]  }
  0x84   :  { %740 = vmatpush2.bf16.msra.mxu0 %v1809_v62  ;;  %v1896_v62 = vld [vmem:[#allocation7 + $0xe4] ss:$8 sps:$4 sm:$0xff]  }
  0x85   :  { %741 = vmatprep.subr.bf16.mxu0 %v1813_v63  ;;  %781 = vmatpush2.bf16.msra.mxu1 %v1812_v0  ;;  %v1894_v63 = vld [vmem:[#allocation7 + $0xe0] ss:$8 sps:$4 sm:$0xff]   ;;  %v1899_v0 = vld [vmem:[#allocation7 + $0xd4] ss:$8 sps:$4 sm:$0xff]  }
  0x86   :  { %782 = vmatprep.subr.bf16.mxu1 %v1816_v2  ;;  %v1902_v2 = vld [vmem:[#allocation7 + $0xc4] ss:$8 sps:$4 sm:$0xff]  }
  0x88   :  { %742 = vmatpush2.bf16.msra.mxu0 %v1815_v1  ;;  %v1897_v1 = vld [vmem:[#allocation7 + $0xd0] ss:$8 sps:$4 sm:$0xff]  }
  0x89   :  { %793 = vmatprep.subr.bf16.mxu0 %v1821_v5  ;;  %783 = vmatpush2.bf16.msra.mxu1 %v1818_v3  ;;  %v1900_v3 = vld [vmem:[#allocation7 + $0xc0] ss:$8 sps:$4 sm:$0xff]   ;;  %v1903_v5 = vld [vmem:[#allocation7 + $0xb0] ss:$8 sps:$4 sm:$0xff]  }
  0x8a   :  { %1040 = vmatprep.subr.bf16.mxu1 %v1869_v45 }
  0x8b   :  { %744 = vmatmul.mubr.bf16.vlgmr.msra.gmra.mxu0 %v117_v7  ;;  %v1906_v7 = vld [vmem:[#allocation7 + $0xa0] ss:$8 sps:$4 sm:$0xff]  }
  0x8c   :  { %794 = vmatpush1.bf16.msra.mxu0 %v1819_v8  ;;  %785 = vmatmul.mubr.bf16.vlgmr.msra.gmra.mxu1 %v119_v9  ;;  %v1911_v8 = vld [vmem:[#allocation7 + $0x94] ss:$8 sps:$4 sm:$0xff]   ;;  %v1909_v9 = vld [vmem:[#allocation7 + $0x90] ss:$8 sps:$4 sm:$0xff]  }
  0x8d   :  { %795 = vmatprep.subr.bf16.mxu0 %v1824_v10  ;;  %825 = vmatprep.mubr.bf16.mxu0 %v122_v14  ;;  %v1914_v10 = vld [vmem:[#allocation7 + $0x84] ss:$8 sps:$4 sm:$0xff]  }
  0x8e   :  { %1041 = vmatpush1.bf16.msra.mxu1 %v1867_v44  ;;  %v1920_v14 = vld [vmem:[#allocation9 + $0x64] ss:$8 sps:$4 sm:$0xff]  }
  0x8f   :  { %1042 = vmatprep.subr.bf16.mxu1 %v1872_v46 }
  0x90   :  { %796 = vmatpush1.bf16.msra.mxu0 %v1822_v11  ;;  %v1912_v11 = vld [vmem:[#allocation7 + $0x80] ss:$8 sps:$4 sm:$0xff]  }
  0x91   :  { %797 = vmatprep.subr.bf16.mxu0 %v1827_v13  ;;  %v1917_v13 = vld [vmem:[#allocation9 + $0x74] ss:$8 sps:$4 sm:$0xff]  }
  0x92   :  { %1043 = vmatpush1.bf16.msra.mxu1 %v1870_v47 }
  0x93   :  { %1044 = vmatprep.subr.bf16.mxu1 %v1875_v48  ;;  %v221_v48 = vlaneseq }
  0x94   :  { %798 = vmatpush1.bf16.msra.mxu0 %v1825_v15  ;;  %v1918_v15 = vld [vmem:[#allocation9 + $0x60] ss:$8 sps:$4 sm:$0xff]  }
  0x95   :  { %799 = vmatprep.subr.bf16.mxu0 %v1830_v16  ;;  %v1923_v16 = vld [vmem:[#allocation9 + $0x54] ss:$8 sps:$4 sm:$0xff]  }
  0x96   :  { %1045 = vmatpush1.bf16.msra.mxu1 %v1873_v49  ;;  %v222_v49 = vshrl.u32 %v221_v48, 7 }
  0x97   :  { %1046 = vmatprep.subr.bf16.mxu1 %v1878_v50 }
  0x98   :  { %800 = vmatpush1.bf16.msra.mxu0 %v1828_v17  ;;  %v1921_v17 = vld [vmem:[#allocation9 + $0x50] ss:$8 sps:$4 sm:$0xff]   ;;  %v2194_v50 = vsub.s32 0, %v222_v49 }
  0x99   :  { %801 = vmatprep.subr.bf16.mxu0 %v1833_v18  ;;  %v1926_v18 = vld [vmem:[#allocation9 + $0x44] ss:$8 sps:$4 sm:$0xff]  }
  0x9a   :  { %1047 = vmatpush1.bf16.msra.mxu1 %v1876_v51  ;;  %v219_v51 = vld [vmem:[#allocation6] sm:$0x3] }
  0x9b   :  { %1048 = vmatprep.subr.bf16.mxu1 %v1881_v52  ;;  %v2196_v52 = vsub.s32 1, %v222_v49 }
  0x9c   :  { %802 = vmatpush1.bf16.msra.mxu0 %v1831_v19  ;;  %v1924_v19 = vld [vmem:[#allocation9 + $0x40] ss:$8 sps:$4 sm:$0xff]  }
  0x9d   :  { %803 = vmatprep.subr.bf16.mxu0 %v1836_v20  ;;  %v1929_v20 = vld [vmem:[#allocation9 + $0x34] ss:$8 sps:$4 sm:$0xff]  }
  0x9e   :  { %1049 = vmatpush1.bf16.msra.mxu1 %v1879_v53  ;;  %v224_v53 = vrot.slane %v219_v51, %v2194_v50 }
  0x9f   :  { %1050 = vmatprep.subr.bf16.mxu1 %v1884_v54  ;;  %v228_v54 = vrot.slane %v219_v51, %v2196_v52 }
  0xa0   :  { %804 = vmatpush1.bf16.msra.mxu0 %v1834_v21  ;;  %v1927_v21 = vld [vmem:[#allocation9 + $0x30] ss:$8 sps:$4 sm:$0xff]  }
  0xa1   :  { %805 = vmatprep.subr.bf16.mxu0 %v1839_v22  ;;  %v1932_v22 = vld [vmem:[#allocation9 + $0x24] ss:$8 sps:$4 sm:$0xff]  }
  0xa2   :  { %1051 = vmatpush1.bf16.msra.mxu1 %v1882_v55 }
  0xa3   :  { %1052 = vmatprep.subr.bf16.mxu1 %v1887_v56 }
  0xa4   :  { %806 = vmatpush1.bf16.msra.mxu0 %v1837_v23  ;;  %v1930_v23 = vld [vmem:[#allocation9 + $0x20] ss:$8 sps:$4 sm:$0xff]  }
  0xa5   :  { %807 = vmatprep.subr.bf16.mxu0 %v1842_v24  ;;  %v1935_v24 = vld [vmem:[#allocation9 + $0x14] ss:$8 sps:$4 sm:$0xff]  }
  0xa6   :  { %1053 = vmatpush1.bf16.msra.mxu1 %v1885_v57 }
  0xa7   :  { %1054 = vmatprep.subr.bf16.mxu1 %v1890_v58 }
  0xa8   :  { %808 = vmatpush1.bf16.msra.mxu0 %v1840_v25  ;;  %v1933_v25 = vld [vmem:[#allocation9 + $0x10] ss:$8 sps:$4 sm:$0xff]  }
  0xa9   :  { %809 = vmatprep.subr.bf16.mxu0 %v1845_v26  ;;  %v1938_v26 = vld [vmem:[#allocation9 + $0x4] ss:$8 sps:$4 sm:$0xff]  }
  0xaa   :  { %1055 = vmatpush1.bf16.msra.mxu1 %v1888_v59 }
  0xab   :  { %1056 = vmatprep.subr.bf16.mxu1 %v1893_v60 }
  0xac   :  { %810 = vmatpush2.bf16.msra.mxu0 %v1843_v27  ;;  %v1936_v27 = vld [vmem:[#allocation9] ss:$8 sps:$4 sm:$0xff]  }
  0xad   :  { %811 = vmatprep.subr.bf16.mxu0 %v1848_v28  ;;  %v1941_v28 = vld [vmem:[#allocation9 + $0xf4] ss:$8 sps:$4 sm:$0xff]  }
  0xae   :  { %1057 = vmatpush2.bf16.msra.mxu1 %v1891_v61 }
  0xaf   :  { %1058 = vmatprep.subr.bf16.mxu1 %v1896_v62 }
  0xb0   :  { %812 = vmatpush2.bf16.msra.mxu0 %v1846_v29  ;;  %v1939_v29 = vld [vmem:[#allocation9 + $0xf0] ss:$8 sps:$4 sm:$0xff]  }
  0xb1   :  { %813 = vmatprep.subr.bf16.mxu0 %v1851_v30  ;;  %v1944_v30 = vld [vmem:[#allocation9 + $0xe4] ss:$8 sps:$4 sm:$0xff]  }
  0xb2   :  { %1059 = vmatpush2.bf16.msra.mxu1 %v1894_v63 }
  0xb3   :  { %1060 = vmatprep.subr.bf16.mxu1 %v1899_v0 }
  0xb4   :  { %814 = vmatpush2.bf16.msra.mxu0 %v1849_v31  ;;  %v1942_v31 = vld [vmem:[#allocation9 + $0xe0] ss:$8 sps:$4 sm:$0xff]  }
  0xb5   :  { %815 = vmatprep.subr.bf16.mxu0 %v1854_v32  ;;  %v1947_v32 = vld [vmem:[#allocation9 + $0xd4] ss:$8 sps:$4 sm:$0xff]  }
  0xb6   :  { %1061 = vmatpush2.bf16.msra.mxu1 %v1897_v1 }
  0xb7   :  { %1062 = vmatprep.subr.bf16.mxu1 %v1902_v2 }
  0xb8   :  { %816 = vmatpush2.bf16.msra.mxu0 %v1852_v33  ;;  %v1945_v33 = vld [vmem:[#allocation9 + $0xd0] ss:$8 sps:$4 sm:$0xff]  }
  0xb9   :  { %817 = vmatprep.subr.bf16.mxu0 %v1857_v34  ;;  %v1950_v34 = vld [vmem:[#allocation9 + $0xc4] ss:$8 sps:$4 sm:$0xff]  }
  0xba   :  { %1063 = vmatpush2.bf16.msra.mxu1 %v1900_v3  ;;  %v1959_v3 = vld [vmem:[#allocation9 + $0x94] ss:$8 sps:$4 sm:$0xff]  }
  0xbb   :  { %1064 = vmatprep.subr.bf16.mxu1 %v1905_v4  ;;  %v1957_v4 = vld [vmem:[#allocation9 + $0x90] ss:$8 sps:$4 sm:$0xff]  }
  0xbc   :  { %818 = vmatpush2.bf16.msra.mxu0 %v1855_v35  ;;  %v1948_v35 = vld [vmem:[#allocation9 + $0xc0] ss:$8 sps:$4 sm:$0xff]  }
  0xbd   :  { %819 = vmatprep.subr.bf16.mxu0 %v1860_v36  ;;  %v1953_v36 = vld [vmem:[#allocation9 + $0xb4] ss:$8 sps:$4 sm:$0xff]  }
  0xbe   :  { %1065 = vmatpush2.bf16.msra.mxu1 %v1903_v5  ;;  %v1962_v5 = vld [vmem:[#allocation9 + $0x84] ss:$8 sps:$4 sm:$0xff]  }
  0xbf   :  { %1066 = vmatprep.subr.bf16.mxu1 %v1908_v6  ;;  %v1960_v6 = vld [vmem:[#allocation9 + $0x80] ss:$8 sps:$4 sm:$0xff]  }
  0xc0   :  { %820 = vmatpush2.bf16.msra.mxu0 %v1858_v37  ;;  %v1951_v37 = vld [vmem:[#allocation9 + $0xb0] ss:$8 sps:$4 sm:$0xff]  }
  0xc1   :  { %821 = vmatprep.subr.bf16.mxu0 %v1863_v38  ;;  %v1956_v38 = vld [vmem:[#allocation9 + $0xa4] ss:$8 sps:$4 sm:$0xff]  }
  0xc2   :  { %1067 = vmatpush2.bf16.msra.mxu1 %v1906_v7  ;;  %v1963_v7 = vld [vmem:[#allocation10 + $0x78] sm:$0xff]  }
  0xc3   :  { %1068 = vmatprep.subr.bf16.mxu1 %v1911_v8  ;;  %v1964_v8 = vld [vmem:[#allocation10 + $0x38] sm:$0xff]  }
  0xc4   :  { %822 = vmatpush2.bf16.msra.mxu0 %v1861_v39  ;;  %v1954_v39 = vld [vmem:[#allocation9 + $0xa0] ss:$8 sps:$4 sm:$0xff]  }
  0xc5   :  { %823 = vmatprep.subr.bf16.mxu0 %v1866_v40 }
  0xc6   :  { %1069 = vmatpush2.bf16.msra.mxu1 %v1909_v9  ;;  %v1965_v9 = vld [vmem:[#allocation10 + $0x70] sm:$0xff]  }
  0xc7   :  { %1070 = vmatprep.subr.bf16.mxu1 %v1914_v10  ;;  %v1966_v10 = vld [vmem:[#allocation10 + $0x30] sm:$0xff]  }
  0xc8   :  { %824 = vmatpush2.bf16.msra.mxu0 %v1864_v41 }
  0xc9   :  { %1287 = vmatprep.subr.bf16.mxu0 %v1917_v13  ;;  %v1969_v13 = vld [vmem:[#allocation10 + $0x60] sm:$0xff]  }
  0xca   :  { %1071 = vmatpush2.bf16.msra.mxu1 %v1912_v11  ;;  %v1967_v11 = vld [vmem:[#allocation10 + $0x68] sm:$0xff]  }
  0xcb   :  { %826 = vmatmul.mubr.bf16.vlgmr.msra.gmra.mxu0 %v121_v43  ;;  %1691 = vmatprep.subr.bf16.mxu1 %v1963_v7 }
  0xcc   :  { %1288 = vmatpush1.bf16.msra.mxu0 %v1915_v12  ;;  %v1968_v12 = vld [vmem:[#allocation10 + $0x28] sm:$0xff]  }
  0xcd   :  { %1289 = vmatprep.subr.bf16.mxu0 %v1920_v14  ;;  %v1970_v14 = vld [vmem:[#allocation10 + $0x20] sm:$0xff]  }
  0xd0   :  { %1290 = vmatpush1.bf16.msra.mxu0 %v1918_v15  ;;  %v1971_v15 = vld [vmem:[#allocation10 + $0x58] sm:$0xff]  }
  0xd1   :  { %1291 = vmatprep.subr.bf16.mxu0 %v1923_v16  ;;  %v1972_v16 = vld [vmem:[#allocation10 + $0x18] sm:$0xff]  }
  0xd4   :  { %1292 = vmatpush1.bf16.msra.mxu0 %v1921_v17  ;;  %v1973_v17 = vld [vmem:[#allocation10 + $0x50] sm:$0xff]  }
  0xd5   :  { %1293 = vmatprep.subr.bf16.mxu0 %v1926_v18  ;;  %v1974_v18 = vld [vmem:[#allocation10 + $0x10] sm:$0xff]  }
  0xd8   :  { %1294 = vmatpush1.bf16.msra.mxu0 %v1924_v19  ;;  %v868_v19 = vld [vmem:[%s2220_s4] sm:$0x3] }
  0xd9   :  { %1295 = vmatprep.subr.bf16.mxu0 %v1929_v20  ;;  %v873_v20 = vrot.slane %v868_v19, %v2194_v50 }
  0xdc   :  { %1296 = vmatpush1.bf16.msra.mxu0 %v1927_v21  ;;  %v877_v21 = vrot.slane %v868_v19, %v2196_v52 }
  0xdd   :  { %1297 = vmatprep.subr.bf16.mxu0 %v1932_v22 }
  0xe0   :  { %1298 = vmatpush1.bf16.msra.mxu0 %v1930_v23 }
  0xe1   :  { %1299 = vmatprep.subr.bf16.mxu0 %v1935_v24 }
  0xe4   :  { %1300 = vmatpush1.bf16.msra.mxu0 %v1933_v25 }
  0xe5   :  { %1301 = vmatprep.subr.bf16.mxu0 %v1938_v26 }
  0xe8   :  { %1302 = vmatpush1.bf16.msra.mxu0 %v1936_v27 }
  0xe9   :  { %1303 = vmatprep.subr.bf16.mxu0 %v1941_v28 }
  0xec   :  { %1304 = vmatpush2.bf16.msra.mxu0 %v1939_v29 }
  0xed   :  { %1305 = vmatprep.subr.bf16.mxu0 %v1944_v30  ;;  %v1975_v30 = vld [vmem:[#allocation10 + $0x48] sm:$0xff]  }
  0xf0   :  { %1306 = vmatpush2.bf16.msra.mxu0 %v1942_v31  ;;  %v1976_v31 = vld [vmem:[#allocation10 + $0x8] sm:$0xff]  }
  0xf1   :  { %1307 = vmatprep.subr.bf16.mxu0 %v1947_v32  ;;  %v1977_v32 = vld [vmem:[#allocation10 + $0x40] sm:$0xff]  }
  0xf4   :  { %1308 = vmatpush2.bf16.msra.mxu0 %v1945_v33  ;;  %v1978_v33 = vld [vmem:[#allocation10] sm:$0xff]  }
  0xf5   :  { %1309 = vmatprep.subr.bf16.mxu0 %v1950_v34  ;;  %v1115_v34 = vld [vmem:[%s2222_s6] sm:$0x3] }
  0xf8   :  { %1310 = vmatpush2.bf16.msra.mxu0 %v1948_v35  ;;  %v1120_v35 = vrot.slane %v1115_v34, %v2194_v50 }
  0xf9   :  { %1311 = vmatprep.subr.bf16.mxu0 %v1953_v36  ;;  %v1124_v36 = vrot.slane %v1115_v34, %v2196_v52 }
  0xfc   :  { %1312 = vmatpush2.bf16.msra.mxu0 %v1951_v37 }
  0xfd   :  { %1313 = vmatprep.subr.bf16.mxu0 %v1956_v38 }
 0x100   :  { %1314 = vmatpush2.bf16.msra.mxu0 %v1954_v39 }
 0x101   :  { %1315 = vmatprep.subr.bf16.mxu0 %v1959_v3 }
 0x104   :  { %1316 = vmatpush2.bf16.msra.mxu0 %v1957_v4 }
 0x105   :  { %1317 = vmatprep.subr.bf16.mxu0 %v1962_v5 }
 0x108   :  { %1318 = vmatpush2.bf16.msra.mxu0 %v1960_v6 }
 0x14b   :  { %v745_v40 = vpop.f32.mrf.mxu0 }
 0x14c   :  { %v786_v42 = vpop.f32.mrf.mxu1  ;;  %v746_v55 = vadd.f32 %v745_v40, %v224_v53 }
 0x14d   :  { %v747_v41 = vpop.f32.mrf.mxu0 }
 0x14e   :  { %v788_v44 = vpop.f32.mrf.mxu1  ;;  %v748_v56 = vadd.f32 %v747_v41, %v228_v54  ;;  %v787_v57 = vadd.f32 %v786_v42, %v746_v55 }
 0x14f   :  { %v749_v43 = vpop.f32.mrf.mxu0 }
 0x150   :  { %v790_v46 = vpop.f32.mrf.mxu1  ;;  %v789_v59 = vadd.f32 %v788_v44, %v748_v56 }
 0x151   :  { %v750_v45 = vpop.f32.mrf.mxu0  ;;  %v1674_v46 = vld [vmem:[%s2224_s8] ss:$0 sm:$0xff] }
 0x152   :  { %v791_v47 = vpop.f32.mrf.mxu1 }
 0x18b   :  { %v827_v58 = vpop.f32.mrf.mxu0 }
 0x18c   :  { %v828_v60 = vadd.f32 %v827_v58, %v787_v57 }
 0x18d   :  { %v829_v61 = vpop.f32.mrf.mxu0 }
 0x18e   :  { %v830_v62 = vadd.f32 %v829_v61, %v789_v59  ;;  %v834_v1 = vpack.c.bf16 %v828_v60, %v828_v60 }
 0x18f   :  { %v831_v63 = vpop.f32.mrf.mxu0 }
 0x190   :  { %v835_v0 = vpack.c.bf16 %v830_v62, %v830_v62 }
 0x191   :  { %v832_v2 = vpop.f32.mrf.mxu0 }
 0x192   :  { %1072 = vmatprep.mubr.bf16.mxu1 %v835_v0 }
 0x193   :  { %1073 = vmatmul.mubr.bf16.vlgmr.msra.gmra.mxu1 %v834_v1 }
 0x194   :  { %1692 = vmatpush3.bf16.msra.mxu1 %v1964_v8 }
 0x195   :  { %1693 = vmatprep.subr.bf16.mxu1 %v1965_v9 }
 0x198   :  { %1694 = vmatpush3.bf16.msra.mxu1 %v1966_v10 }
 0x199   :  { %1695 = vmatprep.subr.bf16.mxu1 %v1967_v11 }
 0x19c   :  { %1696 = vmatpush3.bf16.msra.mxu1 %v1968_v12 }
 0x19d   :  { %1697 = vmatprep.subr.bf16.mxu1 %v1969_v13 }
 0x1a0   :  { %1698 = vmatpush3.bf16.msra.mxu1 %v1970_v14 }
 0x1a1   :  { %1699 = vmatprep.subr.bf16.mxu1 %v1971_v15 }
 0x1a4   :  { %1700 = vmatpush3.bf16.msra.mxu1 %v1972_v16 }
 0x1a5   :  { %1701 = vmatprep.subr.bf16.mxu1 %v1973_v17 }
 0x1a8   :  { %1702 = vmatpush3.bf16.msra.mxu1 %v1974_v18 }
 0x1a9   :  { %1703 = vmatprep.subr.bf16.mxu1 %v1975_v30 }
 0x1ac   :  { %1704 = vmatpush3.bf16.msra.mxu1 %v1976_v31 }
 0x1ad   :  { %1705 = vmatprep.subr.bf16.mxu1 %v1977_v32 }
 0x1b0   :  { %1706 = vmatpush3.bf16.msra.mxu1 %v1978_v33 }
 0x253   :  { %v1074_v22 = vpop.f32.mrf.mxu1 }
 0x254   :  { %v1075_v23 = vadd.f32 %v1074_v22, %v873_v20 }
 0x255   :  { %v1076_v24 = vpop.f32.mrf.mxu1 }
 0x256   :  { %v1077_v25 = vadd.f32 %v1076_v24, %v877_v21  ;;  %v1081_v28 = vpack.c.bf16 %v1075_v23, %v1075_v23 }
 0x257   :  { %v1078_v26 = vpop.f32.mrf.mxu1 }
 0x258   :  { %v1082_v27 = vpack.c.bf16 %v1077_v25, %v1077_v25 }
 0x259   :  { %v1079_v29 = vpop.f32.mrf.mxu1 }
 0x25a   :  { %1319 = vmatprep.mubr.bf16.mxu0 %v1082_v27 }
 0x25b   :  { %1320 = vmatmul.mubr.bf16.vlgmr.msra.gmra.mxu0 %v1081_v28 }
 0x31b   :  { %v1321_v37 = vpop.f32.mrf.mxu0 }
 0x31c   :  { %v1322_v38 = vadd.f32 %v1321_v37, %v1120_v35 }
 0x31d   :  { %v1323_v39 = vpop.f32.mrf.mxu0 }
 0x31e   :  { %v1324_v40 = vadd.f32 %v1323_v39, %v1124_v36  ;;  %v1328_v43 = vpack.c.bf16 %v1322_v38, %v1322_v38 }
 0x31f   :  { %v1325_v41 = vpop.f32.mrf.mxu0 }
 0x320   :  { %v1329_v42 = vpack.c.bf16 %v1324_v40, %v1324_v40 }
 0x321   :  { %v1326_v44 = vpop.f32.mrf.mxu0 }
 0x322   :  { %1497 = vmatprep.mubr.bf16.mxu1 %v1329_v42 }
 0x323   :  { %1498 = vmatmul.mubr.bf16.vlgmr.msra.gmra.mxu1 %v1328_v43 }
 0x3e3   :  { %v1707_v45 = vpop.f32.mrf.mxu1 }
 0x3e5   :  { %v1708_v47 = vpop.f32.mrf.mxu1 }
 0x3e6   :  { %v1709_v48 = vadd.f32 %v1708_v47, %v1707_v45 }
 0x3e7   :  { %v1710_v49 = vpop.f32.mrf.mxu1 }
 0x3e8   :  { %v1500_v50 = vadd.f32 %v1709_v48, %v1674_v46 }
 0x3e9   :  { %v1711_v51 = vpop.f32.mrf.mxu1 }
 0x3ea   :  { %1505 = vst [vmem:[%s2225_s9] sm:$0xff] %v1500_v50 }
 0x3eb   :  { %1510 = vsyncpa [#allocation3], 1 }
 0x3ec   :  { %1511 = vsyncpa [#allocation5], 1 }
 0x3ed   :  { %1512 = vsyncpa [#allocation8], 1 }
 0x3ee   :  { %1513 = vsyncpa [#allocation11], 1 }

</bundles_post_ra>
